<compile_context>
chip_gen: v7x
topology: tpu7x:2x2x1
jax: 0.10.0
libtpu: 0.0.40
codegen_flags: <defaults>
</compile_context>

<pallas_src>
import jax
import jax.numpy as jnp
from jax.experimental import pallas as pl
from jax.experimental.pallas import tpu as pltpu


# ---------------------------------------------------------------------------
# Generation-aware VMEM budgets.
# ---------------------------------------------------------------------------
def _vmem_budgets():
    """Returns (working_set_bytes, vmem_limit_bytes)."""
    try:
        cap = int(pltpu.get_tpu_info().vmem_capacity_bytes)
    except Exception:
        cap = 64 * 1024 * 1024                      # conservative: assume v7x-sized VMEM
    if cap >= 96 * 1024 * 1024:                     # v5e / v6e: 128 MiB physical
        return 80 * 1024 * 1024, 100 * 1024 * 1024  # (v5e default scoped limit is only 16 MiB)
    return 26 * 1024 * 1024, 42 * 1024 * 1024       # v7x: 64 MiB physical


def _choose_tiles(R, C, itemsize, working_set):
    """Row tiles for (C, tile, 128) blocks -> (tile_reduce, tile_apply, R_pad)."""
    row_bytes = C * 128 * itemsize
    # Per-channel operands / accumulators are (C, 1, 128) f32 but sublane-pad to (C, 8, 128).
    fixed = 5 * C * 8 * 128 * 4
    avail = max(working_set - fixed, 16 * row_bytes)
    apply_rows = max(8, (avail // (4 * row_bytes)) // 8 * 8)    # 2x in + 2x out buffers
    reduce_rows = max(8, (avail // (2 * row_bytes)) // 8 * 8)   # 2x in buffers (scratch in `fixed`)
    if R <= apply_rows:
        # Whole row axis in a single block for both kernels (block dim == full dim,
        # so no multiple-of-8 requirement).
        return R, R, R
    tile_apply = int(apply_rows)
    R_pad = ((R + tile_apply - 1) // tile_apply) * tile_apply
    n_blocks = R_pad // tile_apply
    k = 1
    for cand in range(min(int(reduce_rows) // tile_apply, n_blocks), 0, -1):
        if n_blocks % cand == 0:
            k = cand
            break
    return tile_apply * k, tile_apply, R_pad


# ---------------------------------------------------------------------------
# Kernel 1: per-(batch, split, channel) sum and shifted sum-of-squares.
# Grid = (N, r_splits, inner_j).  x block = (C, tile_r, 128).  Each step row-sums
# (sublane/XLU) into small (C, 1, 128) VMEM accumulators; the cross-lane reduce
# runs once at the last row tile and writes a (C, 1) partial.
# ---------------------------------------------------------------------------
def _bn_reduce_kernel(x_ref, shift_ref, sum_ref, csumsq_ref, acc_ref, accsq_ref):
    j = pl.program_id(2)

    @pl.when(j == 0)
    def _():
        acc_ref[...] = jnp.zeros_like(acc_ref)
        accsq_ref[...] = jnp.zeros_like(accsq_ref)

    x = x_ref[...].astype(jnp.float32)                       # (C, tile_r, 128)
    xc = x - shift_ref[...]                                  # shift improves sum-of-squares conditioning
    acc_ref[...] += jnp.sum(x, axis=1, keepdims=True)        # (C, 1, 128)
    accsq_ref[...] += jnp.sum(xc * xc, axis=1, keepdims=True)

    @pl.when(j == pl.num_programs(2) - 1)
    def _():
        sum_ref[...] = jnp.sum(acc_ref[...], axis=2)         # (C, 1)
        csumsq_ref[...] = jnp.sum(accsq_ref[...], axis=2)


# ---------------------------------------------------------------------------
# Kernel 2: apply the pre-quantized, pre-fused per-channel affine transform.
# ---------------------------------------------------------------------------
def _bn_apply_kernel(x_ref, scale_ref, bias_ref, out_ref):
    x = x_ref[...].astype(jnp.float32)
    out_ref[...] = (x * scale_ref[...] + bias_ref[...]).astype(out_ref.dtype)


# ---------------------------------------------------------------------------
# Host-side helpers (C-length vectors only — cheap, grid-invariant).
# ---------------------------------------------------------------------------
def _quantize(v, min_v, max_v):
    # Mirrors quantize_tensor_function: symmetric scale from the global absmax.
    t_max = jnp.maximum(jnp.abs(jnp.min(v)), jnp.abs(jnp.max(v)))
    t_max = jnp.where(t_max == 0.0, jnp.float32(1.0), t_max)
    scale = max_v / t_max
    return jnp.clip(jnp.round(scale * v), min_v, max_v) / scale


# ---------------------------------------------------------------------------
# Wrapper: layout view + padding, stats, quantization, running-stat update.
# ---------------------------------------------------------------------------
def batch_norm2d_forward(x, gamma, beta, running_mean, running_var, *,
                         eps=1e-5, momentum=0.9, batch_norm_bit=16,
                         training=True, freeze_norm=False):
    assert x.ndim == 4
    N, C, H, W = x.shape
    min_v = float(-2 ** (batch_norm_bit - 1))
    max_v = float(2 ** (batch_norm_bit - 1) - 1)
    HW = H * W
    n_count = float(N * HW)

    working_set, vmem_limit = _vmem_budgets()
    R = (HW + 127) // 128
    tile_reduce, tile_apply, R_pad = _choose_tiles(R, C, x.dtype.itemsize, working_set)
    HW_pad = R_pad * 128

    # Free, contiguous view + lane-dense zero padding of the flattened spatial axis.
    x_flat = x.reshape(N, C, HW)
    if HW_pad != HW:
        # TODO(synk): mask the tail inside the kernels instead of a host-side pad pass.
        x_flat = jnp.pad(x_flat, ((0, 0), (0, 0), (0, HW_pad - HW)))
    x_v = x_flat.reshape(N, C, R_pad, 128)

    gamma32 = gamma.astype(jnp.float32)
    beta32 = beta.astype(jnp.float32)
    rm32 = running_mean.astype(jnp.float32)
    rv32 = running_var.astype(jnp.float32)

    def chan_op(v):
        # Pre-broadcast to lane width 128: no per-step cross-lane broadcast in-kernel.
        return jnp.broadcast_to(v.astype(jnp.float32).reshape(C, 1, 1), (C, 1, 128))

    chan_spec = pl.BlockSpec((C, 1, 128), lambda *_: (0, 0, 0))

    if training:
        n_blk = R_pad // tile_reduce
        # Second "parallel" axis so both v7x TensorCores get work when N == 1.
        r_splits = 2 if (N < 2 and n_blk >= 2 and n_blk % 2 == 0) else 1
        inner_j = n_blk // r_splits

        x_reduce_spec = pl.BlockSpec(
            (None, C, tile_reduce, 128),
            lambda n, p, j: (n, 0, p * inner_j + j, 0))
        part_spec = pl.BlockSpec((None, None, C, 1), lambda n, p, j: (n, p, 0, 0))

        sums_p, csq_p = pl.pallas_call(
            _bn_reduce_kernel,
            out_shape=(jax.ShapeDtypeStruct((N, r_splits, C, 1), jnp.float32),
                       jax.ShapeDtypeStruct((N, r_splits, C, 1), jnp.float32)),
            grid_spec=pltpu.PrefetchScalarGridSpec(
                num_scalar_prefetch=0,
                grid=(N, r_splits, inner_j),
                in_specs=[x_reduce_spec, chan_spec],
                out_specs=(part_spec, part_spec),
                scratch_shapes=[pltpu.VMEM((C, 1, 128), jnp.float32),
                                pltpu.VMEM((C, 1, 128), jnp.float32)]),
            compiler_params=pltpu.CompilerParams(
                dimension_semantics=("parallel", "parallel", "arbitrary"),
                vmem_limit_bytes=vmem_limit),
        )(x_v, chan_op(rm32))

        s = jnp.sum(sums_p, axis=(0, 1))[:, 0]       # (C,) total sum (zero pad adds nothing)
        csq = jnp.sum(csq_p, axis=(0, 1))[:, 0]      # (C,) total shifted sum of squares incl. pad
        n_pad_total = float(N * (HW_pad - HW))
        if n_pad_total > 0.0:
            csq = csq - n_pad_total * rm32 * rm32    # each padded zero contributed (0 - rm)^2

        mean = s / n_count
        d = mean - rm32
        denom = max(n_count - 1.0, 1.0)              # guard degenerate N*H*W == 1
        # sum((x - mean)^2) = sum((x - shift)^2) - n * (mean - shift)^2   (unbiased var)
        var = (csq - n_count * d * d) / denom
        if not freeze_norm:
            new_rm = momentum * mean + (1.0 - momentum) * rm32
            new_rv = momentum * var * n_count / denom + (1.0 - momentum) * rv32
        else:
            new_rm, new_rv = rm32, rv32
    else:
        mean = rm32
        var = rv32
        new_rm, new_rv = rm32, rv32

    # Hoisted per-channel quantization + affine fusion (C-length vectors, plain JAX).
    sqrt_var = jnp.sqrt(var + eps)
    gamma_sqrt_q = _quantize(gamma32 / sqrt_var, min_v, max_v)
    beta_q = _quantize(beta32, min_v, max_v)
    mean_q = _quantize(mean, min_v, max_v)
    scale = gamma_sqrt_q
    bias = beta_q - mean_q * gamma_sqrt_q

    grid_j = R_pad // tile_apply
    x_apply_spec = pl.BlockSpec((None, C, tile_apply, 128), lambda n, j: (n, 0, j, 0))
    out_apply_spec = pl.BlockSpec((None, C, tile_apply, 128), lambda n, j: (n, 0, j, 0))

    out_v = pl.pallas_call(
        _bn_apply_kernel,
        out_shape=jax.ShapeDtypeStruct((N, C, R_pad, 128), x.dtype),
        grid_spec=pltpu.PrefetchScalarGridSpec(
            num_scalar_prefetch=0,
            grid=(N, grid_j),
            in_specs=[x_apply_spec, chan_spec, chan_spec],
            out_specs=out_apply_spec),
        compiler_params=pltpu.CompilerParams(
            dimension_semantics=("parallel", "parallel"),
            vmem_limit_bytes=vmem_limit),
    )(x_v, chan_op(scale), chan_op(bias))

    out_flat = out_v.reshape(N, C, HW_pad)
    if HW_pad != HW:
        out_flat = out_flat[:, :, :HW]
    out = out_flat.reshape(N, C, H, W)
    # TODO(synk): the nn.Module updates running_mean/running_var in place; they are
    # returned functionally here instead.
    return out, new_rm.astype(running_mean.dtype), new_rv.astype(running_var.dtype)


# ---------------------------------------------------------------------------
# Pure-JAX reference (mirrors BatchNorm2DFunction.forward).
# ---------------------------------------------------------------------------
def _reference(x, gamma, beta, running_mean, running_var, *,
               eps, momentum, min_v, max_v, training, freeze_norm):
    n_count = x.size / x.shape[1]

    def q(v):
        t_max = jnp.maximum(jnp.abs(jnp.min(v)), jnp.abs(jnp.max(v)))
        t_max = jnp.where(t_max == 0.0, 1.0, t_max)
        scale = max_v / t_max
        return jnp.clip(jnp.round(scale * v), min_v, max_v) / scale

    if training:
        sum_v = x.sum(axis=(0, 2, 3))
        mean = sum_v / n_count
        var = jnp.sum((x - mean[None, :, None, None]) ** 2,
                      axis=(0, 2, 3)) / (n_count - 1.0)
        sqrt_var = jnp.sqrt(var + eps)
        if not freeze_norm:
            r_mean = momentum * mean + (1.0 - momentum) * running_mean
            r_var = (momentum * var * n_count / (n_count - 1.0)
                     + (1.0 - momentum) * running_var)
        else:
            r_mean, r_var = running_mean, running_var
    else:
        mean = running_mean
        sqrt_var = jnp.sqrt(running_var + eps)
        r_mean, r_var = running_mean, running_var

    gamma_sqrt = q(gamma / sqrt_var)
    beta_q = q(beta)
    mean_q = q(mean)
    out = ((x - mean_q[None, :, None, None]) * gamma_sqrt[None, :, None, None]
           + beta_q[None, :, None, None])
    return out, r_mean, r_var


def _check(x, gamma, beta, rm, rv):
    out, new_rm, new_rv = batch_norm2d_forward(
        x, gamma, beta, rm, rv, eps=1e-5, momentum=0.9, batch_norm_bit=16,
        training=True, freeze_norm=False)
    jax.block_until_ready((out, new_rm, new_rv))
    ref_out, ref_rm, ref_rv = _reference(
        x, gamma, beta, rm, rv, eps=1e-5, momentum=0.9,
        min_v=float(-2 ** 15), max_v=float(2 ** 15 - 1),
        training=True, freeze_norm=False)
    assert out.shape == x.shape and out.dtype == x.dtype
    assert jnp.allclose(out, ref_out, atol=1e-4, rtol=1e-4), "output mismatch vs reference"
    assert jnp.allclose(new_rm, ref_rm, atol=1e-4, rtol=1e-4), "running_mean mismatch"
    assert jnp.allclose(new_rv, ref_rv, atol=1e-4, rtol=1e-4), "running_var mismatch"


if __name__ == "__main__":
    key = jax.random.PRNGKey(0)

    # Case 1: lane-dense spatial size (HW % 128 == 0), parameters as in __init__.
    num_features = 4
    x = jax.random.normal(key, (2, num_features, 16, 16), dtype=jnp.float32)
    gamma = jnp.ones((num_features,), jnp.float32)
    beta = jnp.zeros((num_features,), jnp.float32)
    running_mean = jnp.zeros((num_features,), jnp.float32)
    running_var = jnp.ones((num_features,), jnp.float32)
    _check(x, gamma, beta, running_mean, running_var)

    # Case 2: odd spatial size (exercises the HW -> 128 padding path) with warm stats.
    k1, k2, k3 = jax.random.split(key, 3)
    c2 = 3
    x2 = jax.random.normal(k1, (1, c2, 7, 7), dtype=jnp.float32)
    gamma2 = jnp.ones((c2,), jnp.float32)
    beta2 = jnp.zeros((c2,), jnp.float32)
    rm2 = 0.1 * jax.random.normal(k2, (c2,), dtype=jnp.float32)
    rv2 = 1.0 + 0.1 * jnp.abs(jax.random.normal(k3, (c2,), dtype=jnp.float32))
    _check(x2, gamma2, beta2, rm2, rv2)

    print("KERNEL_OK")
</pallas_src>

<mosaic_0001>
module attributes {stable_mosaic.version = 11 : i64} {
  func.func @_bn_reduce_kernel(%arg0: i32, %arg1: i32, %arg2: i32, %arg3: memref<1x4x2x128xf32, #tpu.memory_space<vmem>>, %arg4: memref<4x1x128xf32, #tpu.memory_space<vmem>>, %arg5: memref<1x1x4x1xf32, #tpu.memory_space<vmem>>, %arg6: memref<1x1x4x1xf32, #tpu.memory_space<vmem>>, %arg7: memref<4x1x128xf32, #tpu.memory_space<vmem>>, %arg8: memref<4x1x128xf32, #tpu.memory_space<vmem>>) attributes {dimension_semantics = [#tpu.dimension_semantics<parallel>, #tpu.dimension_semantics<parallel>, #tpu.dimension_semantics<arbitrary>], iteration_bounds = array<i64: 2, 1, 1>, scalar_prefetch = 0 : i64, scratch_operands = 2 : i64, tpu.core_type = #tpu.core_type<tc>, window_params = [{transform_indices = @transform_0, window_bounds = array<i64: 1, 4, 2, 128>}, {pipeline_mode = #tpu.pipeline_mode<synchronous>, transform_indices = @transform_1, window_bounds = array<i64: 4, 1, 128>}, {transform_indices = @transform_2, window_bounds = array<i64: 1, 1, 4, 1>}, {transform_indices = @transform_3, window_bounds = array<i64: 1, 1, 4, 1>}]} {
    %c0_i32 = arith.constant 0 : i32
    %0 = arith.cmpi eq, %arg2, %c0_i32 : i32
    %1 = arith.extui %0 : i1 to i32
    %c0_i32_0 = arith.constant 0 : i32
    %2 = arith.cmpi ne, %1, %c0_i32_0 : i32
    scf.if %2 {
      %cst_22 = arith.constant 0.000000e+00 : f32
      %22 = vector.broadcast %cst_22 : f32 to vector<4x1x128xf32>
      %c0_23 = arith.constant 0 : index
      %c0_24 = arith.constant 0 : index
      %c0_25 = arith.constant 0 : index
      %23 = vector.load %arg7[%c0_23, %c0_24, %c0_25] : memref<4x1x128xf32, #tpu.memory_space<vmem>>, vector<4x1x128xf32>
      tpu.vector_store %arg7[%c0_23, %c0_24, %c0_25], %22 {strides = array<i32>} : memref<4x1x128xf32, #tpu.memory_space<vmem>>, vector<4x1x128xf32>,
      %cst_26 = arith.constant 0.000000e+00 : f32
      %24 = vector.broadcast %cst_26 : f32 to vector<4x1x128xf32>
      %c0_27 = arith.constant 0 : index
      %c0_28 = arith.constant 0 : index
      %c0_29 = arith.constant 0 : index
      %25 = vector.load %arg8[%c0_27, %c0_28, %c0_29] : memref<4x1x128xf32, #tpu.memory_space<vmem>>, vector<4x1x128xf32>
      tpu.vector_store %arg8[%c0_27, %c0_28, %c0_29], %24 {strides = array<i32>} : memref<4x1x128xf32, #tpu.memory_space<vmem>>, vector<4x1x128xf32>,
    } else {
    }
    %c0 = arith.constant 0 : index
    %c0_1 = arith.constant 0 : index
    %c0_2 = arith.constant 0 : index
    %c0_3 = arith.constant 0 : index
    %3 = vector.load %arg3[%c0, %c0_1, %c0_2, %c0_3] : memref<1x4x2x128xf32, #tpu.memory_space<vmem>>, vector<1x4x2x128xf32>
    %4 = vector.shape_cast %3 : vector<1x4x2x128xf32> to vector<4x2x128xf32>
    %c0_4 = arith.constant 0 : index
    %c0_5 = arith.constant 0 : index
    %c0_6 = arith.constant 0 : index
    %5 = vector.load %arg4[%c0_4, %c0_5, %c0_6] : memref<4x1x128xf32, #tpu.memory_space<vmem>>, vector<4x1x128xf32>
    %6 = vector.broadcast %5 : vector<4x1x128xf32> to vector<4x2x128xf32>
    %7 = arith.subf %4, %6 : vector<4x2x128xf32>
    %c0_7 = arith.constant 0 : index
    %c0_8 = arith.constant 0 : index
    %c0_9 = arith.constant 0 : index
    %8 = vector.load %arg7[%c0_7, %c0_8, %c0_9] : memref<4x1x128xf32, #tpu.memory_space<vmem>>, vector<4x1x128xf32>
    %cst = arith.constant dense<0.000000e+00> : vector<4x128xf32>
    %9 = vector.multi_reduction <add>, %4, %cst [1] : vector<4x2x128xf32> to vector<4x128xf32>
    %10 = vector.shape_cast %9 : vector<4x128xf32> to vector<4x1x128xf32>
    %11 = arith.addf %8, %10 : vector<4x1x128xf32>
    %c0_10 = arith.constant 0 : index
    %c0_11 = arith.constant 0 : index
    %c0_12 = arith.constant 0 : index
    %12 = vector.load %arg7[%c0_10, %c0_11, %c0_12] : memref<4x1x128xf32, #tpu.memory_space<vmem>>, vector<4x1x128xf32>
    tpu.vector_store %arg7[%c0_10, %c0_11, %c0_12], %11 {strides = array<i32>} : memref<4x1x128xf32, #tpu.memory_space<vmem>>, vector<4x1x128xf32>,
    %c0_13 = arith.constant 0 : index
    %c0_14 = arith.constant 0 : index
    %c0_15 = arith.constant 0 : index
    %13 = vector.load %arg8[%c0_13, %c0_14, %c0_15] : memref<4x1x128xf32, #tpu.memory_space<vmem>>, vector<4x1x128xf32>
    %14 = arith.mulf %7, %7 : vector<4x2x128xf32>
    %cst_16 = arith.constant dense<0.000000e+00> : vector<4x128xf32>
    %15 = vector.multi_reduction <add>, %14, %cst_16 [1] : vector<4x2x128xf32> to vector<4x128xf32>
    %16 = vector.shape_cast %15 : vector<4x128xf32> to vector<4x1x128xf32>
    %17 = arith.addf %13, %16 : vector<4x1x128xf32>
    %c0_17 = arith.constant 0 : index
    %c0_18 = arith.constant 0 : index
    %c0_19 = arith.constant 0 : index
    %18 = vector.load %arg8[%c0_17, %c0_18, %c0_19] : memref<4x1x128xf32, #tpu.memory_space<vmem>>, vector<4x1x128xf32>
    tpu.vector_store %arg8[%c0_17, %c0_18, %c0_19], %17 {strides = array<i32>} : memref<4x1x128xf32, #tpu.memory_space<vmem>>, vector<4x1x128xf32>,
    %c0_i32_20 = arith.constant 0 : i32
    %19 = arith.cmpi eq, %arg2, %c0_i32_20 : i32
    %20 = arith.extui %19 : i1 to i32
    %c0_i32_21 = arith.constant 0 : i32
    %21 = arith.cmpi ne, %20, %c0_i32_21 : i32
    scf.if %21 {
      %c0_22 = arith.constant 0 : index
      %c0_23 = arith.constant 0 : index
      %c0_24 = arith.constant 0 : index
      %22 = vector.load %arg7[%c0_22, %c0_23, %c0_24] : memref<4x1x128xf32, #tpu.memory_space<vmem>>, vector<4x1x128xf32>
      %cst_25 = arith.constant dense<0.000000e+00> : vector<4x1xf32>
      %23 = vector.multi_reduction <add>, %22, %cst_25 [2] : vector<4x1x128xf32> to vector<4x1xf32>
      %c0_26 = arith.constant 0 : index
      %c0_27 = arith.constant 0 : index
      %c0_28 = arith.constant 0 : index
      %c0_29 = arith.constant 0 : index
      %24 = vector.load %arg5[%c0_26, %c0_27, %c0_28, %c0_29] : memref<1x1x4x1xf32, #tpu.memory_space<vmem>>, vector<1x1x4x1xf32>
      %25 = vector.shape_cast %24 : vector<1x1x4x1xf32> to vector<4x1xf32>
      %26 = vector.shape_cast %23 : vector<4x1xf32> to vector<1x1x4x1xf32>
      tpu.vector_store %arg5[%c0_26, %c0_27, %c0_28, %c0_29], %26 {strides = array<i32>} : memref<1x1x4x1xf32, #tpu.memory_space<vmem>>, vector<1x1x4x1xf32>,
      %c0_30 = arith.constant 0 : index
      %c0_31 = arith.constant 0 : index
      %c0_32 = arith.constant 0 : index
      %27 = vector.load %arg8[%c0_30, %c0_31, %c0_32] : memref<4x1x128xf32, #tpu.memory_space<vmem>>, vector<4x1x128xf32>
      %cst_33 = arith.constant dense<0.000000e+00> : vector<4x1xf32>
      %28 = vector.multi_reduction <add>, %27, %cst_33 [2] : vector<4x1x128xf32> to vector<4x1xf32>
      %c0_34 = arith.constant 0 : index
      %c0_35 = arith.constant 0 : index
      %c0_36 = arith.constant 0 : index
      %c0_37 = arith.constant 0 : index
      %29 = vector.load %arg6[%c0_34, %c0_35, %c0_36, %c0_37] : memref<1x1x4x1xf32, #tpu.memory_space<vmem>>, vector<1x1x4x1xf32>
      %30 = vector.shape_cast %29 : vector<1x1x4x1xf32> to vector<4x1xf32>
      %31 = vector.shape_cast %28 : vector<4x1xf32> to vector<1x1x4x1xf32>
      tpu.vector_store %arg6[%c0_34, %c0_35, %c0_36, %c0_37], %31 {strides = array<i32>} : memref<1x1x4x1xf32, #tpu.memory_space<vmem>>, vector<1x1x4x1xf32>,
    } else {
    }
    return
  }
  func.func @transform_0(%arg0: i32, %arg1: i32, %arg2: i32) -> (i32, i32, i32, i32) {
    %c1_i32 = arith.constant 1 : i32
    %0 = arith.muli %arg1, %c1_i32 : i32
    %1 = arith.addi %0, %arg2 : i32
    %c0_i32 = arith.constant 0 : i32
    %c0_i32_0 = arith.constant 0 : i32
    %c0_i32_1 = arith.constant 0 : i32
    return %arg0, %c0_i32, %1, %c0_i32_0 : i32, i32, i32, i32
  }
  func.func @transform_1(%arg0: i32, %arg1: i32, %arg2: i32) -> (i32, i32, i32) {
    %c0_i32 = arith.constant 0 : i32
    %c0_i32_0 = arith.constant 0 : i32
    %c0_i32_1 = arith.constant 0 : i32
    %c0_i32_2 = arith.constant 0 : i32
    return %c0_i32, %c0_i32_0, %c0_i32_1 : i32, i32, i32
  }
  func.func @transform_2(%arg0: i32, %arg1: i32, %arg2: i32) -> (i32, i32, i32, i32) {
    %c0_i32 = arith.constant 0 : i32
    %c0_i32_0 = arith.constant 0 : i32
    %c0_i32_1 = arith.constant 0 : i32
    return %arg0, %arg1, %c0_i32, %c0_i32_0 : i32, i32, i32, i32
  }
  func.func @transform_3(%arg0: i32, %arg1: i32, %arg2: i32) -> (i32, i32, i32, i32) {
    %c0_i32 = arith.constant 0 : i32
    %c0_i32_0 = arith.constant 0 : i32
    %c0_i32_1 = arith.constant 0 : i32
    return %arg0, %arg1, %c0_i32, %c0_i32_0 : i32, i32, i32, i32
  }
}

</mosaic_0001>

<bundles_post_ra>
// kernel: tpu_custom_call.1
= control target key start
LH: loop header
LB: loop body
LE: loop exit
PB: predicated region body
PF: predicated region fallthrough
CT: control target
= control target key end

     0   :  { %9 = vsyncpa [#allocation5], 0  ;;  %s1017_s0 = inlined_call_operand.hbm [shape: f32[2,4,2,128], index: 0, kind: input, shape index: {}]   ;;  %s1018_s1 = inlined_call_operand.hbm [shape: f32[4,1,128], index: 1, kind: input, shape index: {}]   ;;  %s1019_s2 = inlined_call_operand.vmem [shape: f32[2,1,4,1], index: 2, kind: output, shape index: {0}]   ;;  %s1020_s3 = inlined_call_operand.vmem [shape: f32[2,1,4,1], index: 3, kind: output, shape index: {1}]  }
   0x1   :  { %11 = vsyncpa [#allocation5 + $0x1], 0 }
   0x2   :  { %12 = vsyncpa [#allocation7], 0  ;;  %s826_s12 = smov 0   ;;  %s828_s13 = smov 0  }
   0x3   :  { %s830_s14 = smov 0   ;;  %s832_s15 = smov 0  }
   0x4   :  { %s834_s16 = smov 0   ;;  %s836_s17 = smov 0  }
   0x5 LB: > { %s594_s18 = sadd.s32 4294967295, %s797_s17   ;;  %p61_p0 = scmp.ne.s32.totalorder %s781_s13, %s777_s12  ;;  %s797_s17 = sphi %s836_s17, %s18_s17   ;;  %s793_s16 = sphi %s834_s16, %s1037_s16   ;;  %s789_s15 = sphi %s832_s15, %s1036_s15   ;;  %s785_s14 = sphi %s830_s14, %s1035_s14   ;;  %s781_s13 = sphi %s828_s13, %s1034_s13   ;;  %s777_s12 = sphi %s826_s12, %s1033_s12  }
   0x6   : > { %p856_p1 = scmp.eq.s32.totalorder %s594_s18, 0  ;;  %p596_p2 = scmp.ge.s32.totalorder %s797_s17, 1 }
   0x7   : > { %p149_p3 = scmp.lt.s32.totalorder %s797_s17, 3  ;;  %s799_s22 = smov [#allocation6]  }
   0x8   : > { %s1025_s19 = scalar_select %p856_p1, 1, 0 }
   0x9   : > { %p864_p4 = por %p856_p1, %p61_p0  ;;  %p868_p5 = pnand %p596_p2, %p149_p3 }
   0xa   : > { %s161_s23 = sshll.u32 %s799_s22, 4  ;;  %s37_s25 = sadd.s32 1, %s793_s16  ;;  %s162_s23 = int_to_ptr.vmem [resolvable:$true] %s161_s23 }
   0xb   : > { %s1026_s20 = scalar_select %p864_p4, 1, 0 }
   0xc   : > { %s1027_s21 = scalar_select %p868_p5, 1, 0 }
   0xd   : > { %p620_p6 = pneg %p868_p5  ;;  %s685_s28 = scalar_lea.hbm %s1018_s1, 64 }
   0xe   : > { %p686_p8 = scmp.ne.s32.totalorder %s1018_s1, %s685_s28  ;;  %p692_p12 = scmp.lt.u32.totalorder %s685_s28, %s1018_s1 }
   0xf   : > { %p876_p7 = pnand %p620_p6, %p856_p1 }
  0x11   : > { %p687_p9 = pneg %p876_p7 }
  0x13   : > { %p688_p10 = pnand %p687_p9, %p686_p8 }
  0x15   : > { %p689_p11 = pneg %p688_p10 }
  0x17   : > { %p694_p13 = pnand %p692_p12, %p689_p11 }
  0x19   : > { %697 = shalt.err (!%p694_p13)
}
  0x1a   : > { %s698_s6 = scalar_lea.vmem %s162_s23, 64  ;;  %p706_p6 = scmp.lt.s32.totalorder %s162_s23, %s162_s23 }
  0x1b   : > { %p699_p0 = scmp.ne.s32.totalorder %s162_s23, %s698_s6  ;;  %p707_p1 = scmp.lt.s32.totalorder %s698_s6, %s698_s6 }
  0x1d   : > { %p701_p2 = pnand %p699_p0, %p687_p9  ;;  %p708_p4 = por %p707_p1, %p706_p6 }
  0x1f   : > { %p702_p3 = pneg %p701_p2 }
  0x21   : > { %p709_p5 = pnand %p708_p4, %p702_p3 }
  0x23   : > { %712 = shalt.err (!%p709_p5)
}
  0x24   : > { %s800_s7 = smov 16   ;;  %s801_s8 = smov 1  }
  0x25   : > { %623 = dma.hbm_to_vmem [thread:$0]  (!%p876_p7), %s1018_s1, 64, %s162_s23, [#allocation7], %s800_s7, %s800_s7, %s801_s8  }
  0x26   : > { %p39_p1 = scmp.ge.s32.totalorder %s37_s25, 2  ;;  %s48_s11 = sadd.s32 1, %s785_s14 }
  0x27   : > { %p55_p4 = scmp.ne.s32.totalorder %s785_s14, %s781_s13  ;;  %p56_p5 = scmp.eq.s32.totalorder %s797_s17, 0 }
  0x28   : > { %s1039_s25 = smov (%p39_p1, %s37_s25), 0  ;;  %p629_p9 = scmp.lt.s32.totalorder %s797_s17, 2 }
  0x29   : > { %p57_p8 = por %p56_p5, %p55_p4  ;;  %s43_s12 = ssub.s32 %s793_s16, %s1039_s25 }
  0x2a   : > { %s175_s18 = sand.u32 1, %s785_s14   ;;  %p46_p10 = scmp.eq.s32.totalorder %s43_s12, 0 }
  0x2b   : > { %s599_s22 = sshll.u32 %s175_s18, 3  ;;  %s613_s26 = sshll.u32 %s793_s16, 7 }
  0x2c   : > { %s909_s27 = scalar_select %p46_p10, %s785_s14, %s48_s11  }
  0x2d   : > { %s914_s23 = scalar_lea.hbm %s1017_s0, %s613_s26  ;;  %s179_s29 = scalar_lea.vmem [#allocation4], %s599_s22 }
  0x2e   : > { %s188_s30 = sshll.u32 %s179_s29, 4  ;;  %p916_p7 = pnand %p629_p9, %p57_p8  ;;  %s920_s30 = int_to_ptr.vmem [resolvable:$true] %s188_s30 }
  0x2f   : > { %s922_s5 = scalar_lea.sflag [#allocation5], %s175_s18  ;;  %s713_s6 = scalar_lea.hbm %s914_s23, 128 }
  0x30   : > { %p714_p11 = scmp.ne.s32.totalorder %s914_s23, %s713_s6  ;;  %p715_p12 = pneg %p916_p7 }
  0x31   : > { %s718_s9 = scalar_lea.hbm %s1017_s0, 256  ;;  %p719_p2 = scmp.lt.u32.totalorder %s914_s23, %s1017_s0 }
  0x32   : > { %p716_p13 = pnand %p715_p12, %p714_p11  ;;  %p720_p3 = scmp.lt.u32.totalorder %s718_s9, %s713_s6 }
  0x33   : > { %p722_p1 = scmp.lt.u32.totalorder %s713_s6, %s914_s23 }
  0x34   : > { %p717_p0 = pneg %p716_p13  ;;  %p721_p6 = por %p720_p3, %p719_p2 }
  0x36   : > { %p723_p4 = por %p722_p1, %p721_p6 }
  0x38   : > { %p724_p5 = pnand %p723_p4, %p717_p0 }
  0x3a   : > { %727 = shalt.err (!%p724_p5)
}
  0x3b   : > { %s728_s12 = scalar_lea.vmem %s920_s30, 128  ;;  %s802_s18 = smov [#allocation4]  }
  0x3c   : > { %p729_p8 = scmp.ne.s32.totalorder %s920_s30, %s728_s12  ;;  %s733_s22 = sshll.u32 %s802_s18, 4  ;;  %s734_s22 = int_to_ptr.vmem [resolvable:$false] %s733_s22 }
  0x3d   : > { %s735_s26 = scalar_lea.vmem %s734_s22, 256  ;;  %p736_p11 = scmp.lt.s32.totalorder %s920_s30, %s734_s22 }
  0x3e   : > { %p731_p9 = pnand %p729_p8, %p715_p12  ;;  %p737_p13 = scmp.lt.s32.totalorder %s735_s26, %s728_s12 }
  0x40   : > { %p732_p10 = pneg %p731_p9  ;;  %p738_p2 = por %p737_p13, %p736_p11 }
  0x42   : > { %p739_p3 = pnand %p738_p2, %p732_p10 }
  0x44   : > { %742 = shalt.err (!%p739_p3)
}
  0x45   : > { %s803_s24 = smov 32   ;;  %s804_s28 = smov 2  }
  0x46   : > { %627 = dma.hbm_to_vmem [thread:$0]  (!%p916_p7), %s914_s23, 128, %s920_s30, %s922_s5, %s803_s24, %s803_s24, %s804_s28  }
  0x47   : > { %p1030_p12 = scmp.ne.s32.totalorder %s1027_s21, 0 }
  0x48   : > { %s202_s29 = sand.u32 (!%p1030_p12), 1, %s781_s13   ;;  %p1031_p0 = scmp.ne.s32.totalorder (!%p1030_p12), %s1026_s20, 0 }
  0x49   : > { %200 = sbr.rel (%p1030_p12) target bundleno = 270 (0x10e), region = 28  ;;  %s603_s6 = sshll.u32 (!%p1030_p12), %s202_s29, 3 }
  0x4a   : > { %s203_s7 = scalar_lea.sflag (!%p1030_p12), [#allocation5], %s202_s29  ;;  %s953_s8 = scalar_lea.vmem (!%p1030_p12), [#allocation4], %s603_s6 }
  0x50   : > { %768 = dma.done.wait (%p1031_p0), %s203_s7, 128  }
  0x51   : > { %770 = vsyncadd (%p1031_p0), %s203_s7, 4294967168  ;;  %p1032_p6 = scmp.ne.s32.totalorder %s1025_s19, 0 }
  0x53   : > { %772 = dma.done.wait (%p1032_p6), [#allocation7], 64  }
  0x54   : > { %774 = vsyncadd (%p1032_p6), [#allocation7], 4294967232  ;;  %v805_v0 = vmov 0.0   ;;  %vm309_vm0 = vcmask 1041408   ;;  %v271_v1 = vld [vmem:[%s953_s8 + $0x4] sm:$0x3] }
  0x55   : > { %263 = vst [vmem:[#allocation2 + $0x2] sm:$0x1] %v805_v0  ;;  %261 = vst [vmem:[#allocation2] sm:$0x1] %v805_v0  ;;  %v609_v2 = vld [vmem:[#allocation6 + $0x2] ss:$0 sm:$0xff] }
  0x56   : > { %262 = vst [vmem:[#allocation2 + $0x1] sm:$0x1] %v805_v0  ;;  %264 = vst [vmem:[#allocation2 + $0x3] sm:$0x1] %v805_v0  ;;  %v270_v3 = vld [vmem:[%s953_s8 + $0x2] sm:$0x3]  ;;  %v303_v4 = vsub.f32 %v271_v1, %v609_v2 }
  0x57   : > { %265 = vst [vmem:[#allocation3] sm:$0x1] %v805_v0  ;;  %266 = vst [vmem:[#allocation3 + $0x1] sm:$0x1] %v805_v0  ;;  %v324_v5 = vsel %vm309_vm0, %v271_v1, 0.0  ;;  %v317_v7 = vsel %vm309_vm0, %v270_v3, 0.0 }
  0x58   : > { %267 = vst [vmem:[#allocation3 + $0x2] sm:$0x1] %v805_v0  ;;  %268 = vst [vmem:[#allocation3 + $0x3] sm:$0x1] %v805_v0  ;;  %v608_v6 = vld [vmem:[#allocation6 + $0x1] ss:$0 sm:$0xff]  ;;  %v352_v12 = vmul.f32 %v303_v4, %v303_v4 }
  0x59   : > { %v325_v8 = vrot.slane %v324_v5, 4  ;;  %v302_v9 = vsub.f32 %v270_v3, %v608_v6  ;;  %v318_v10 = vrot.slane %v317_v7, 4  ;;  %v272_v11 = vld [vmem:[%s953_s8 + $0x6] sm:$0x3]  ;;  %v610_v13 = vld [vmem:[#allocation6 + $0x3] ss:$0 sm:$0xff] }
  0x5a   : > { %v331_v14 = vsel %vm309_vm0, %v272_v11, 0.0  ;;  %v304_v18 = vsub.f32 %v272_v11, %v610_v13  ;;  %v269_v19 = vld [vmem:[%s953_s8] sm:$0x3]  ;;  %v607_v20 = vld [vmem:[#allocation6] ss:$0 sm:$0xff]  ;;  %v368_v24 = vsel %vm309_vm0, %v352_v12, 0.0 }
  0x5b   : > { %v326_v15 = vadd.f32 %v325_v8, %v324_v5  ;;  %v319_v16 = vadd.f32 %v318_v10, %v317_v7  ;;  %v351_v17 = vmul.f32 %v302_v9, %v302_v9  ;;  %v332_v21 = vrot.slane %v331_v14, 4  ;;  %p243_p7 = scmp.lt.s32.totalorder %s789_s15, 1 }
  0x5c   : > { %v301_v22 = vsub.f32 %v269_v19, %v607_v20  ;;  %v310_v23 = vsel %vm309_vm0, %v269_v19, 0.0  ;;  %v369_v28 = vrot.slane %v368_v24, 4  ;;  %v353_v31 = vmul.f32 %v304_v18, %v304_v18  ;;  %v307_v45 = vld [vmem:[#allocation2 + $0x2] sm:$0x1]  ;;  %v305_v1 = vld [vmem:[#allocation2] sm:$0x1] }
  0x5d   : > { %v327_v25 = vrot.slane %v326_v15, 2  ;;  %v320_v26 = vrot.slane %v319_v16, 2  ;;  %v311_v27 = vrot.slane %v310_v23, 4  ;;  %v333_v29 = vadd.f32 %v332_v21, %v331_v14  ;;  %v306_v46 = vld [vmem:[#allocation2 + $0x1] sm:$0x1]  ;;  %s1041_s15 = smov (!%p243_p7, %s789_s15), 1 }
  0x5e   : > { %v361_v30 = vsel %vm309_vm0, %v351_v17, 0.0  ;;  %v350_v32 = vmul.f32 %v301_v22, %v301_v22  ;;  %v370_v36 = vadd.f32 %v369_v28, %v368_v24  ;;  %v375_v39 = vsel %vm309_vm0, %v353_v31, 0.0  ;;  %v308_v61 = vld [vmem:[#allocation2 + $0x3] sm:$0x1]  ;;  %v347_v14 = vld [vmem:[#allocation3 + $0x1] sm:$0x1] }
  0x5f   : > { %v328_v33 = vadd.f32 %v327_v25, %v326_v15  ;;  %v321_v34 = vadd.f32 %v320_v26, %v319_v16  ;;  %v312_v35 = vadd.f32 %v311_v27, %v310_v23  ;;  %v334_v37 = vrot.slane %v333_v29, 2  ;;  %v348_v2 = vld [vmem:[#allocation3 + $0x2] sm:$0x1]  ;;  %v349_v18 = vld [vmem:[#allocation3 + $0x3] sm:$0x1]  ;;  %s605_s19 = sshll.u32 %s1041_s15, 2 }
  0x60   : > { %v362_v38 = vrot.slane %v361_v30, 4  ;;  %v354_v40 = vsel %vm309_vm0, %v350_v32, 0.0  ;;  %v371_v44 = vrot.slane %v370_v36, 2  ;;  %v376_v49 = vrot.slane %v375_v39, 4  ;;  %v346_v19 = vld [vmem:[#allocation3] sm:$0x1]  ;;  %s249_s23 = scalar_lea.vmem %s1019_s2, %s605_s19  ;;  %s256_s4 = scalar_lea.vmem %s1020_s3, %s605_s19 }
  0x61   : > { %v329_v41 = vrot.slane %v328_v33, 1  ;;  %v322_v42 = vrot.slane %v321_v34, 1  ;;  %v313_v43 = vrot.slane %v312_v35, 2  ;;  %v335_v47 = vadd.f32 %v334_v37, %v333_v29 }
  0x62   : > { %v363_v48 = vadd.f32 %v362_v38, %v361_v30  ;;  %v355_v50 = vrot.slane %v354_v40, 4  ;;  %v372_v54 = vadd.f32 %v371_v44, %v370_v36  ;;  %v377_v57 = vadd.f32 %v376_v49, %v375_v39 }
  0x63   : > { %v330_v51 = vadd.f32 %v329_v41, %v328_v33  ;;  %v323_v52 = vadd.f32 %v322_v42, %v321_v34  ;;  %v314_v53 = vadd.f32 %v313_v43, %v312_v35  ;;  %v336_v55 = vrot.slane %v335_v47, 1 }
  0x64   : > { %v364_v56 = vrot.slane %v363_v48, 2  ;;  %v356_v58 = vadd.f32 %v355_v50, %v354_v40  ;;  %v373_v63 = vrot.slane %v372_v54, 1  ;;  %v378_v4 = vrot.slane %v377_v57, 2 }
  0x65   : > { %v340_v59 = vadd.f32 %v330_v51, %v307_v45  ;;  %v339_v60 = vadd.f32 %v323_v52, %v306_v46  ;;  %v315_v62 = vrot.slane %v314_v53, 1  ;;  %v337_v0 = vadd.f32 %v336_v55, %v335_v47 }
  0x66   : > { %v365_v3 = vadd.f32 %v364_v56, %v363_v48  ;;  %v357_v5 = vrot.slane %v356_v58, 2  ;;  %v374_v7 = vadd.f32 %v373_v63, %v372_v54  ;;  %v379_v10 = vadd.f32 %v378_v4, %v377_v57 }
  0x67   : > { %344 = vst [vmem:[#allocation2 + $0x2] sm:$0x1] %v340_v59  ;;  %343 = vst [vmem:[#allocation2 + $0x1] sm:$0x1] %v339_v60  ;;  %v316_v6 = vadd.f32 %v315_v62, %v314_v53  ;;  %v341_v8 = vadd.f32 %v337_v0, %v308_v61  ;;  %vm397_vm1 = vcmask 1040384   ;;  %vm415_vm2 = vcmask 1041409  }
  0x68   : > { %v366_v9 = vrot.slane %v365_v3, 1  ;;  %v358_v11 = vadd.f32 %v357_v5, %v356_v58  ;;  %v384_v13 = vadd.f32 %v374_v7, %v348_v2  ;;  %v380_v16 = vrot.slane %v379_v10, 1 }
  0x69   : > { %v338_v12 = vadd.f32 %v316_v6, %v305_v1  ;;  %345 = vst [vmem:[#allocation2 + $0x3] sm:$0x1] %v341_v8  ;;  %vm418_vm3 = vcmask 1042434   ;;  %vm421_vm4 = vcmask 1043459   ;;  %vm424_vm5 = vcmask 3072  }
  0x6a   : > { %v367_v15 = vadd.f32 %v366_v9, %v365_v3  ;;  %v359_v17 = vrot.slane %v358_v11, 1  ;;  %388 = vst [vmem:[#allocation3 + $0x2] sm:$0x1] %v384_v13  ;;  %v381_v21 = vadd.f32 %v380_v16, %v379_v10 }
  0x6b   : > { %342 = vst [vmem:[#allocation2] sm:$0x1] %v338_v12 }
  0x6c   : > { %v383_v20 = vadd.f32 %v367_v15, %v347_v14  ;;  %v360_v22 = vadd.f32 %v359_v17, %v358_v11  ;;  %v385_v25 = vadd.f32 %v381_v21, %v349_v18 }
  0x6e   : > { %v395_v23 = vld [vmem:[#allocation2 + $0x2] sm:$0x1]  ;;  %v394_v24 = vld [vmem:[#allocation2 + $0x1] sm:$0x1]  ;;  %387 = vst [vmem:[#allocation3 + $0x1] sm:$0x1] %v383_v20  ;;  %v382_v26 = vadd.f32 %v360_v22, %v346_v19 }
  0x6f   : > { %v404_v27 = vsel %vm397_vm1, %v395_v23, 0.0  ;;  %v401_v28 = vsel %vm397_vm1, %v394_v24, 0.0  ;;  %389 = vst [vmem:[#allocation3 + $0x3] sm:$0x1] %v385_v25 }
  0x70   : > { %405 = vadd.xlane.f32.xlu1 %v404_v27  ;;  %402 = vadd.xlane.f32.xlu0 %v401_v28  ;;  %386 = vst [vmem:[#allocation3] sm:$0x1] %v382_v26  ;;  %v396_v29 = vld [vmem:[#allocation2 + $0x3] sm:$0x1] }
  0x71   : > { %v407_v30 = vsel %vm397_vm1, %v396_v29, 0.0  ;;  %v428_v32 = vld [vmem:[#allocation3 + $0x2] sm:$0x1] }
  0x72   : > { %v393_v31 = vld [vmem:[#allocation2] sm:$0x1]  ;;  %v436_v34 = vsel %vm397_vm1, %v428_v32, 0.0 }
  0x73   : > { %v398_v33 = vsel %vm397_vm1, %v393_v31, 0.0 }
  0x74   : > { %408 = vadd.xlane.f32.xlu1 %v407_v30  ;;  %399 = vadd.xlane.f32.xlu0 %v398_v33 }
  0x75   : > { %v427_v35 = vld [vmem:[#allocation3 + $0x1] sm:$0x1] }
  0x76   : > { %v433_v36 = vsel %vm397_vm1, %v427_v35, 0.0  ;;  %v429_v37 = vld [vmem:[#allocation3 + $0x3] sm:$0x1] }
  0x77   : > { %v426_v38 = vld [vmem:[#allocation3] sm:$0x1]  ;;  %v439_v39 = vsel %vm397_vm1, %v429_v37, 0.0 }
  0x78   : > { %437 = vadd.xlane.f32.xlu1 %v436_v34  ;;  %434 = vadd.xlane.f32.xlu0 %v433_v36  ;;  %v430_v40 = vsel %vm397_vm1, %v426_v38, 0.0 }
  0x7c   : > { %440 = vadd.xlane.f32.xlu1 %v439_v39  ;;  %431 = vadd.xlane.f32.xlu0 %v430_v40 }
  0xfd   : > { %v406_v41 = vpop.xlane.xlu1 %405  ;;  %v403_v42 = vpop.xlane.xlu0 %402 }
  0xfe   : > { %v414_v43 = vrot.slane %v403_v42, 7  ;;  %v417_v44 = vrot.slane %v406_v41, 6 }
 0x101   : > { %v409_v45 = vpop.xlane.xlu1 %408  ;;  %v400_v46 = vpop.xlane.xlu0 %399 }
 0x102   : > { %v420_v47 = vrot.slane %v409_v45, 5  ;;  %v416_v48 = vsel %vm415_vm2, %v414_v43, %v400_v46 }
 0x103   : > { %v419_v49 = vsel %vm418_vm3, %v417_v44, %v416_v48 }
 0x104   : > { %v422_v50 = vsel %vm421_vm4, %v420_v47, %v419_v49 }
 0x105   : > { %425 = vst.msk [vmem:[%s249_s23] sm:$0xf] %vm424_vm5, %v422_v50  ;;  %v438_v51 = vpop.xlane.xlu1 %437  ;;  %v435_v52 = vpop.xlane.xlu0 %434 }
 0x106   : > { %v446_v53 = vrot.slane %v435_v52, 7  ;;  %v448_v54 = vrot.slane %v438_v51, 6 }
 0x109   : > { %v441_v55 = vpop.xlane.xlu1 %440  ;;  %v432_v56 = vpop.xlane.xlu0 %431 }
 0x10a   : > { %v450_v57 = vrot.slane %v441_v55, 5  ;;  %v447_v58 = vsel %vm415_vm2, %v446_v53, %v432_v56 }
 0x10b   : > { %v449_v59 = vsel %vm418_vm3, %v448_v54, %v447_v58 }
 0x10c   : > { %v451_v60 = vsel %vm421_vm4, %v450_v57, %v449_v59 }
 0x10d   : > { %453 = vst.msk [vmem:[%s256_s4] sm:$0xf] %vm424_vm5, %v451_v60 }
 0x10e PF: > { %s18_s17 = sadd.s32 1, %s797_s17   ;;  %s1033_s12 = smov %s781_s13 }
 0x10f   : > { %p15_p1 = scmp.ge.s32.totalorder %s18_s17, 4   ;;  %s1034_s13 = smov %s785_s14 }
 0x110   : > { %s1035_s14 = smov %s909_s27  ;;  %s1036_s15 = smov %s793_s16 }
 0x111   : > { %s1037_s16 = smov %s1039_s25  ;;  %17 = sbr.rel (!%p15_p1) target bundleno = 5 (0x5), region = 92 }
 0x118   :  { %499 = vsyncpa [#allocation5], 1 }
 0x119   :  { %501 = vsyncpa [#allocation5 + $0x1], 1 }
 0x11a   :  { %502 = vsyncpa [#allocation7], 1 }

</bundles_post_ra>
